<compile_context>
chip_gen: v5e
topology: v5e:2x2
jax: 0.10.0
libtpu: 0.0.40
codegen_flags: <defaults>
</compile_context>

<pallas_src>
import functools

import jax
import jax.numpy as jnp
from jax.experimental import pallas as pl
from jax.experimental.pallas import tpu as pltpu


_LANE = 128
# Target for the double-buffered per-step working set (inputs + output).
# 12 MiB fits comfortably under the default scoped VMEM on every generation
# (16 MiB v5e, 32 MiB v6e/v7x) and leaves headroom on v7x's 64 MiB physical.
_VMEM_TILE_BUDGET = 12 * 1024 * 1024
_VMEM_LIMIT_BYTES = 32 * 1024 * 1024


def _sublane_multiple(dtype):
    """Second-minor block dims must be a multiple of this (or the full dim)."""
    itemsize = jnp.dtype(dtype).itemsize
    return 8 * max(1, 4 // itemsize)      # f32 -> 8, bf16 -> 16, int8 -> 32


def _round_up(x, m):
    return ((x + m - 1) // m) * m


def _largest_aligned_divisor(extent, align, cap):
    """Largest multiple of `align` that divides `extent` and is <= cap, or None."""
    cap = min(cap, extent)
    best = None
    c = align
    while c <= cap:
        if extent % c == 0:
            best = c
        c += align
    return best


def _stack_dense_kernel(*refs, n):
    """Lane-dense path.

    refs[0:n] : (tile_outer, inner) VMEM blocks of the n inputs (inner % 128 == 0)
    refs[n]   : (tile_outer, n*inner) VMEM block of the 2-D output view

    Builds the interleaved block in registers and does ONE dense, unmasked
    store (single vst-slot friendly, important on v5e).
    """
    out_ref = refs[n]
    if n == 1:
        out_ref[...] = refs[0][...]
    else:
        out_ref[...] = jnp.concatenate([refs[i][...] for i in range(n)], axis=-1)


def _stack_sublane_kernel(*refs, n):
    """Fallback path (inner not 128-aligned, or too large for full-inner blocks).

    refs[0:n] : (tile_outer, tile_inner) VMEM blocks of the n inputs
    refs[n]   : (tile_outer, n, tile_inner) VMEM block of the 3-D output view
    """
    # TODO(synk): for tiny `inner` (e.g. stack(dim=-1) -> inner==1) a lane
    # interleave (folding part of `outer` into the lane axis) would avoid the
    # masked single-sublane stores below; kept simple/proven here.
    out_ref = refs[n]
    for i in range(n):
        out_ref[:, i, :] = refs[i][...]


def pallas_stack(tensors, dim):
    """Equivalent of torch.stack(tensors, dim) for a list of same-shape arrays."""
    tensors = list(tensors)
    n = len(tensors)
    assert n >= 1
    shape = tensors[0].shape
    dtype = tensors[0].dtype
    for t in tensors:
        assert t.shape == shape and t.dtype == dtype

    rank_out = len(shape) + 1
    d = dim if dim >= 0 else dim + rank_out
    assert 0 <= d < rank_out

    outer = 1
    for s in shape[:d]:
        outer *= s
    inner = 1
    for s in shape[d:]:
        inner *= s

    out_shape = shape[:d] + (n,) + shape[d:]
    if outer * inner == 0:
        return jnp.zeros(out_shape, dtype)

    itemsize = jnp.dtype(dtype).itemsize
    sub = _sublane_multiple(dtype)

    # Flatten (metadata-only, no transposes).
    flat = [t.reshape(outer, inner) for t in tensors]

    # Smallest legal outer tile (second-minor block dims must be a multiple of
    # the sublane pack or the full extent), used to decide which path fits.
    min_to = sub if (outer >= sub and outer % sub == 0) else outer
    # Per grid step: n input blocks + 1 output block, each double-buffered.
    per_step_min = 4 * n * min_to * inner * itemsize

    use_dense = (inner % _LANE == 0) and (per_step_min <= _VMEM_TILE_BUDGET)

    if use_dense:
        # ---------------- primary path: 2-D lane-dense output ---------------
        per_row = 4 * n * inner * itemsize
        max_rows = max(1, _VMEM_TILE_BUDGET // per_row)
        cap = min(max_rows, 512)
        tile_outer = None
        if outer > sub:
            tile_outer = _largest_aligned_divisor(outer, sub, cap)
        if tile_outer is None:
            tile_outer = outer            # full extent is always legal
        grid = (outer // tile_outer,)

        kernel = functools.partial(_stack_dense_kernel, n=n)
        in_spec = pl.BlockSpec((tile_outer, inner), lambda oi: (oi, 0))
        out_spec = pl.BlockSpec((tile_outer, n * inner), lambda oi: (oi, 0))
        out_struct = jax.ShapeDtypeStruct((outer, n * inner), dtype)
        dim_sem = ("parallel",)
    else:
        # ------------- fallback: 3-D output, inner tiled if aligned ---------
        tile_inner = _largest_aligned_divisor(inner, _LANE, 2048)
        if tile_inner is None:
            tile_inner = inner            # full extent (non-128-aligned inner)
        ti_pad = _round_up(tile_inner, _LANE)
        n_pad = _round_up(n, sub)
        denom = 2 * (n + n_pad) * ti_pad * itemsize
        max_rows = max(1, _VMEM_TILE_BUDGET // denom)
        cap = min(max_rows, 512)
        tile_outer = None
        if outer > sub:
            tile_outer = _largest_aligned_divisor(outer, sub, cap)
        if tile_outer is None:
            tile_outer = outer
        grid = (outer // tile_outer, inner // tile_inner)

        kernel = functools.partial(_stack_sublane_kernel, n=n)
        in_spec = pl.BlockSpec((tile_outer, tile_inner), lambda oi, ii: (oi, ii))
        out_spec = pl.BlockSpec((tile_outer, n, tile_inner),
                                lambda oi, ii: (oi, 0, ii))
        out_struct = jax.ShapeDtypeStruct((outer, n, inner), dtype)
        dim_sem = ("parallel", "parallel")

    out_flat = pl.pallas_call(
        kernel,
        out_shape=out_struct,
        grid_spec=pltpu.PrefetchScalarGridSpec(
            num_scalar_prefetch=0,
            grid=grid,
            in_specs=[in_spec] * n,
            out_specs=out_spec,
        ),
        compiler_params=pltpu.CompilerParams(
            dimension_semantics=dim_sem,
            vmem_limit_bytes=_VMEM_LIMIT_BYTES,
        ),
    )(*flat)

    return out_flat.reshape(out_shape)


class Stack:
    """JAX/Pallas counterpart of the PyTorch `Stack` module."""

    def __init__(self, dim):
        self.dim = dim

    def __call__(self, x):
        return pallas_stack(list(x), self.dim)


if __name__ == "__main__":
    key = jax.random.PRNGKey(0)
    k1, k2, k3, k4 = jax.random.split(key, 4)

    # Three tensors of shape (B=2, C=4, H=16, W=16), stacked along dim=1.
    shape = (2, 4, 16, 16)
    xs = [
        jax.random.normal(k1, shape, dtype=jnp.float32),
        jax.random.normal(k2, shape, dtype=jnp.float32),
        jax.random.normal(k3, shape, dtype=jnp.float32),
    ]

    module = Stack(dim=1)
    out = jax.block_until_ready(module(xs))
    ref = jnp.stack(xs, axis=1)
    assert out.shape == ref.shape == (2, 3, 4, 16, 16), out.shape
    assert out.dtype == ref.dtype
    assert bool(jnp.array_equal(out, ref))

    # Negative dim (tiny-inner fallback path, outer tiled across the grid).
    out_neg = jax.block_until_ready(Stack(dim=-1)(xs))
    assert bool(jnp.array_equal(out_neg, jnp.stack(xs, axis=-1)))

    # dim=0 (outer == 1, lane-dense path with full-outer block).
    out0 = jax.block_until_ready(Stack(dim=0)(xs))
    assert bool(jnp.array_equal(out0, jnp.stack(xs, axis=0)))

    # Lane-dense path with a multi-step outer grid (outer tiling + pipelining).
    ys = [jax.random.normal(k, (1024, 128), dtype=jnp.float32)
          for k in jax.random.split(k4, 3)]
    outy = jax.block_until_ready(Stack(dim=1)(ys))
    assert bool(jnp.array_equal(outy, jnp.stack(ys, axis=1)))

    print("KERNEL_OK")
</pallas_src>

<mosaic_0001>
module attributes {stable_mosaic.version = 11 : i64} {
  func.func @_stack_dense_kernel(%arg0: i32, %arg1: memref<2x1024xf32, #tpu.memory_space<vmem>>, %arg2: memref<2x1024xf32, #tpu.memory_space<vmem>>, %arg3: memref<2x1024xf32, #tpu.memory_space<vmem>>, %arg4: memref<2x3072xf32, #tpu.memory_space<vmem>>) attributes {dimension_semantics = [#tpu.dimension_semantics<parallel>], iteration_bounds = array<i64: 1>, scalar_prefetch = 0 : i64, scratch_operands = 0 : i64, tpu.core_type = #tpu.core_type<tc>, window_params = [{transform_indices = @transform_0, window_bounds = array<i64: 2, 1024>}, {transform_indices = @transform_1, window_bounds = array<i64: 2, 1024>}, {transform_indices = @transform_2, window_bounds = array<i64: 2, 1024>}, {transform_indices = @transform_3, window_bounds = array<i64: 2, 3072>}]} {
    %c0 = arith.constant 0 : index
    %c0_0 = arith.constant 0 : index
    %0 = vector.load %arg1[%c0, %c0_0] : memref<2x1024xf32, #tpu.memory_space<vmem>>, vector<2x1024xf32>
    %c0_1 = arith.constant 0 : index
    %c0_2 = arith.constant 0 : index
    %1 = vector.load %arg2[%c0_1, %c0_2] : memref<2x1024xf32, #tpu.memory_space<vmem>>, vector<2x1024xf32>
    %c0_3 = arith.constant 0 : index
    %c0_4 = arith.constant 0 : index
    %2 = vector.load %arg3[%c0_3, %c0_4] : memref<2x1024xf32, #tpu.memory_space<vmem>>, vector<2x1024xf32>
    %3 = tpu.concatenate %0, %1, %2 in 1 : vector<2x1024xf32>, vector<2x1024xf32>, vector<2x1024xf32> -> vector<2x3072xf32>
    %c0_5 = arith.constant 0 : index
    %c0_6 = arith.constant 0 : index
    %4 = vector.load %arg4[%c0_5, %c0_6] : memref<2x3072xf32, #tpu.memory_space<vmem>>, vector<2x3072xf32>
    tpu.vector_store %arg4[%c0_5, %c0_6], %3 {strides = array<i32>} : memref<2x3072xf32, #tpu.memory_space<vmem>>, vector<2x3072xf32>,
    return
  }
  func.func @transform_0(%arg0: i32) -> (i32, i32) {
    %c0_i32 = arith.constant 0 : i32
    %c0_i32_0 = arith.constant 0 : i32
    return %arg0, %c0_i32 : i32, i32
  }
  func.func @transform_1(%arg0: i32) -> (i32, i32) {
    %c0_i32 = arith.constant 0 : i32
    %c0_i32_0 = arith.constant 0 : i32
    return %arg0, %c0_i32 : i32, i32
  }
  func.func @transform_2(%arg0: i32) -> (i32, i32) {
    %c0_i32 = arith.constant 0 : i32
    %c0_i32_0 = arith.constant 0 : i32
    return %arg0, %c0_i32 : i32, i32
  }
  func.func @transform_3(%arg0: i32) -> (i32, i32) {
    %c0_i32 = arith.constant 0 : i32
    %c0_i32_0 = arith.constant 0 : i32
    return %arg0, %c0_i32 : i32, i32
  }
}

</mosaic_0001>

<bundles_post_ra>
// kernel: tpu_custom_call.1
= control target key start
LH: loop header
LB: loop body
LE: loop exit
PB: predicated region body
PF: predicated region fallthrough
CT: control target
= control target key end

     0   :  { %8 = vsyncpa [#allocation3], 0  ;;  %s330_s0 = inlined_call_operand.hbm [shape: f32[2,1024], index: 0, kind: input, shape index: {}]   ;;  %s331_s1 = inlined_call_operand.hbm [shape: f32[2,1024], index: 1, kind: input, shape index: {}]   ;;  %s332_s2 = inlined_call_operand.hbm [shape: f32[2,1024], index: 2, kind: input, shape index: {}]   ;;  %s333_s3 = inlined_call_operand.hbm [shape: f32[2,3072], index: 3, kind: output, shape index: {}]  }
   0x1   :  { %9 = vsyncpa [#allocation6], 0  ;;  %s27_s14 = sshll.u32 %s331_s1, 4  ;;  %s28_s14 = int_to_ptr.hbm [resolvable:$true] %s27_s14 }
   0x2   :  { %10 = vsyncpa [#allocation4], 0  ;;  %s276_s15 = smov [#allocation5]   ;;  %s16_s19 = sshll.u32 %s330_s0, 4  ;;  %s17_s19 = int_to_ptr.hbm [resolvable:$true] %s16_s19 }
   0x3   :  { %s29_s16 = sshll.u32 %s276_s15, 4  ;;  %s277_s20 = smov [#allocation2]   ;;  %s30_s16 = int_to_ptr.vmem [resolvable:$true] %s29_s16 }
   0x4   :  { %32 = dma.hbm_to_vmem [thread:$0]  %s28_s14, 256, %s30_s16, [#allocation6]  }
   0x5   :  { %s18_s21 = sshll.u32 %s277_s20, 4  ;;  %s38_s24 = sshll.u32 %s332_s2, 4  ;;  %s19_s21 = int_to_ptr.vmem [resolvable:$true] %s18_s21  ;;  %s39_s24 = int_to_ptr.hbm [resolvable:$true] %s38_s24 }
   0x6   :  { %21 = dma.hbm_to_vmem [thread:$0]  %s17_s19, 256, %s19_s21, [#allocation3]  }
   0x7   :  { %s278_s1 = smov [#allocation7]  }
   0x8   :  { %s40_s25 = sshll.u32 %s278_s1, 4  ;;  %s41_s25 = int_to_ptr.vmem [resolvable:$true] %s40_s25 }
   0x9   :  { %43 = dma.hbm_to_vmem [thread:$0]  %s39_s24, 256, %s41_s25, [#allocation6]  }
   0xa   :  { %270 = dma.done.wait [#allocation3], 256  }
   0xb   :  { %271 = vsyncadd [#allocation3], 4294967040 }
   0xc   :  { %272 = dma.done.wait [#allocation6], 512  }
   0xd   :  { %273 = vsyncadd [#allocation6], 4294966784  ;;  %v56_v0 = vld [vmem:[#allocation2] sm:$0xff]  ;;  %v57_v1 = vld [vmem:[#allocation2 + $0x8] sm:$0xff]  ;;  %vm119_vm0 = vcmask 1041408   ;;  %vm121_vm1 = vcmask 1045508  }
   0xe   :  { %64 = vst [vmem:[#allocation1] ss:$4 sm:$0xff] %v56_v0  ;;  %v58_v2 = vld [vmem:[#allocation5] sm:$0xff]  ;;  %vm123_vm2 = vcmask 1043456   ;;  %v59_v5 = vld [vmem:[#allocation5 + $0x8] sm:$0xff]  ;;  %v60_v24 = vld [vmem:[#allocation7] sm:$0xff] }
   0xf   :  { %66 = vst [vmem:[#allocation1 + $0x20] ss:$4 sm:$0xff] %v57_v1  ;;  %v61_v29 = vld [vmem:[#allocation7 + $0x8] sm:$0xff]  ;;  %s279_s0 = smov [#allocation8]   ;;  %s159_s28 = sshll.u32 %s333_s3, 4  ;;  %s160_s28 = int_to_ptr.hbm [resolvable:$true] %s159_s28 }
  0x10   :  { %s157_s2 = sshll.u32 %s279_s0, 4  ;;  %s158_s2 = int_to_ptr.vmem [resolvable:$true] %s157_s2 }
  0x15   :  { %v67_v3 = vld.sshfl [vmem:[#allocation1] sm:$0xff pattern:$0x73625140]  ;;  %v68_v4 = vld.sshfl [vmem:[#allocation1 + $0x8] sm:$0xff pattern:$0x73625140] }
  0x16   :  { %v69_v6 = vld.sshfl [vmem:[#allocation1 + $0x10] sm:$0xff pattern:$0x73625140]  ;;  %v70_v7 = vld.sshfl [vmem:[#allocation1 + $0x18] sm:$0xff pattern:$0x73625140] }
  0x17   :  { %77 = vst [vmem:[#allocation1] ss:$4 sm:$0xff] %v58_v2  ;;  %v71_v8 = vld.sshfl [vmem:[#allocation1 + $0x20] sm:$0xff pattern:$0x73625140]  ;;  %v101_v9 = vrot.slane %v68_v4, 6 }
  0x18   :  { %v72_v10 = vld.sshfl [vmem:[#allocation1 + $0x28] sm:$0xff pattern:$0x73625140]  ;;  %v73_v11 = vld.sshfl [vmem:[#allocation1 + $0x30] sm:$0xff pattern:$0x73625140] }
  0x19   :  { %v74_v12 = vld.sshfl [vmem:[#allocation1 + $0x38] sm:$0xff pattern:$0x73625140]  ;;  %v102_v13 = vrot.slane %v69_v6, 4  ;;  %v103_v14 = vrot.slane %v70_v7, 2  ;;  %v120_v15 = vsel %vm119_vm0, %v67_v3, %v101_v9  ;;  %v104_v16 = vrot.slane %v72_v10, 6 }
  0x1a   :  { %79 = vst [vmem:[#allocation1 + $0x20] ss:$4 sm:$0xff] %v59_v5  ;;  %v105_v17 = vrot.slane %v73_v11, 4  ;;  %v106_v18 = vrot.slane %v74_v12, 2 }
  0x1b   :  { %v122_v19 = vsel %vm121_vm1, %v102_v13, %v103_v14  ;;  %v125_v20 = vsel %vm119_vm0, %v71_v8, %v104_v16 }
  0x1c   :  { %v124_v21 = vsel %vm123_vm2, %v120_v15, %v122_v19  ;;  %v126_v22 = vsel %vm121_vm1, %v105_v17, %v106_v18 }
  0x1d   :  { %146 = vst [vmem:[#allocation8] sm:$0xff] %v124_v21  ;;  %v127_v23 = vsel %vm123_vm2, %v125_v20, %v126_v22 }
  0x1e   :  { %147 = vst [vmem:[#allocation8 + $0x8] sm:$0xff] %v127_v23  ;;  %v80_v25 = vld.sshfl [vmem:[#allocation1] sm:$0xff pattern:$0x73625140] }
  0x1f   :  { %v81_v26 = vld.sshfl [vmem:[#allocation1 + $0x8] sm:$0xff pattern:$0x73625140]  ;;  %v82_v27 = vld.sshfl [vmem:[#allocation1 + $0x10] sm:$0xff pattern:$0x73625140] }
  0x20   :  { %v83_v28 = vld.sshfl [vmem:[#allocation1 + $0x18] sm:$0xff pattern:$0x73625140]  ;;  %v107_v30 = vrot.slane %v81_v26, 6  ;;  %v108_v31 = vrot.slane %v82_v27, 4 }
  0x21   :  { %90 = vst [vmem:[#allocation1] ss:$4 sm:$0xff] %v60_v24  ;;  %v84_v32 = vld.sshfl [vmem:[#allocation1 + $0x20] sm:$0xff pattern:$0x73625140]  ;;  %v109_v33 = vrot.slane %v83_v28, 2 }
  0x22   :  { %v85_v34 = vld.sshfl [vmem:[#allocation1 + $0x28] sm:$0xff pattern:$0x73625140]  ;;  %v86_v35 = vld.sshfl [vmem:[#allocation1 + $0x30] sm:$0xff pattern:$0x73625140]  ;;  %v128_v36 = vsel %vm119_vm0, %v80_v25, %v107_v30 }
  0x23   :  { %v87_v37 = vld.sshfl [vmem:[#allocation1 + $0x38] sm:$0xff pattern:$0x73625140]  ;;  %v129_v38 = vsel %vm121_vm1, %v108_v31, %v109_v33  ;;  %v110_v39 = vrot.slane %v85_v34, 6  ;;  %v111_v40 = vrot.slane %v86_v35, 4 }
  0x24   :  { %92 = vst [vmem:[#allocation1 + $0x20] ss:$4 sm:$0xff] %v61_v29  ;;  %v130_v41 = vsel %vm123_vm2, %v128_v36, %v129_v38  ;;  %v112_v42 = vrot.slane %v87_v37, 2 }
  0x25   :  { %148 = vst [vmem:[#allocation8 + $0x10] sm:$0xff] %v130_v41  ;;  %v131_v43 = vsel %vm119_vm0, %v84_v32, %v110_v39 }
  0x26   :  { %v132_v44 = vsel %vm121_vm1, %v111_v40, %v112_v42 }
  0x27   :  { %v133_v45 = vsel %vm123_vm2, %v131_v43, %v132_v44 }
  0x28   :  { %149 = vst [vmem:[#allocation8 + $0x18] sm:$0xff] %v133_v45  ;;  %v94_v46 = vld.sshfl [vmem:[#allocation1 + $0x8] sm:$0xff pattern:$0x73625140] }
  0x29   :  { %v95_v47 = vld.sshfl [vmem:[#allocation1 + $0x10] sm:$0xff pattern:$0x73625140]  ;;  %v96_v48 = vld.sshfl [vmem:[#allocation1 + $0x18] sm:$0xff pattern:$0x73625140] }
  0x2a   :  { %v113_v49 = vrot.slane %v94_v46, 6  ;;  %v114_v50 = vrot.slane %v95_v47, 4  ;;  %v93_v51 = vld.sshfl [vmem:[#allocation1] sm:$0xff pattern:$0x73625140]  ;;  %v115_v52 = vrot.slane %v96_v48, 2 }
  0x2b   :  { %v98_v54 = vld.sshfl [vmem:[#allocation1 + $0x28] sm:$0xff pattern:$0x73625140]  ;;  %v99_v55 = vld.sshfl [vmem:[#allocation1 + $0x30] sm:$0xff pattern:$0x73625140] }
  0x2c   :  { %v134_v53 = vsel %vm119_vm0, %v93_v51, %v113_v49  ;;  %v135_v56 = vsel %vm121_vm1, %v114_v50, %v115_v52  ;;  %v100_v57 = vld.sshfl [vmem:[#allocation1 + $0x38] sm:$0xff pattern:$0x73625140]  ;;  %v116_v58 = vrot.slane %v98_v54, 6  ;;  %v117_v59 = vrot.slane %v99_v55, 4 }
  0x2d   :  { %v136_v60 = vsel %vm123_vm2, %v134_v53, %v135_v56  ;;  %v97_v61 = vld.sshfl [vmem:[#allocation1 + $0x20] sm:$0xff pattern:$0x73625140]  ;;  %v118_v62 = vrot.slane %v100_v57, 2 }
  0x2e   :  { %150 = vst [vmem:[#allocation8 + $0x20] sm:$0xff] %v136_v60  ;;  %v137_v63 = vsel %vm119_vm0, %v97_v61, %v116_v58 }
  0x2f   :  { %v138_v0 = vsel %vm121_vm1, %v117_v59, %v118_v62 }
  0x30   :  { %v139_v1 = vsel %vm123_vm2, %v137_v63, %v138_v0 }
  0x31   :  { %151 = vst [vmem:[#allocation8 + $0x28] sm:$0xff] %v139_v1 }
  0x32   :  { %162 = dma.vmem_to_hbm [thread:$0]  %s158_s2, 768, %s160_s28, [#allocation4]  }
  0x33   :  { %274 = dma.done.wait [#allocation4], 768  }
  0x34   :  { %275 = vsyncadd [#allocation4], 4294966528 }
  0x35   :  { %167 = vsyncpa [#allocation3], 1 }
  0x36   :  { %168 = vsyncpa [#allocation6], 1 }
  0x37   :  { %169 = vsyncpa [#allocation4], 1 }

</bundles_post_ra>
